<compile_context>
chip_gen: v7x
topology: tpu7x:2x2x1
jax: 0.10.0
libtpu: 0.0.40
codegen_flags: <defaults>
</compile_context>

<pallas_src>
import functools
import math

import numpy as np

import jax
import jax.numpy as jnp
from jax.experimental import pallas as pl
from jax.experimental.pallas import tpu as pltpu


# -----------------------------------------------------------------------------
# helpers
# -----------------------------------------------------------------------------
def _round_up(a, b):
    return (a + b - 1) // b * b


def _pick_block_n(N, C, mid, HW, cp1, cp2, vmem_budget=24 * 1024 * 1024):
    """Images per grid step, capped by a VMEM budget and by N//2 (so the
    'parallel' grid axis has >= 2 blocks for v7x's two TensorCores)."""
    per_img = (9 * cp1 + 9 * cp2 + mid + C        # taps1/taps2 + membranes (f32)
               + 2 * 2 * C                        # x & out tiles, double-buffered
               + 9) * HW * 4                      # tap masks
    cap = max(1, int(vmem_budget) // per_img)
    if N >= 2:
        cap = min(cap, N // 2)                    # keep n_blocks >= 2
    b = max(1, min(N, cap))
    while N % b:
        b -= 1
    return b


def _conv3x3_tap_masks(H, W, block_n):
    """(9, block_n*H*W) {0,1} masks: validity of each 3x3 tap per pixel,
    tiled along the lane-concatenated image axis."""
    hw = H * W
    l = np.arange(hw)
    r, c = l // W, l % W
    rows = []
    for dy in (-1, 0, 1):
        for dx in (-1, 0, 1):
            rows.append(((r + dy >= 0) & (r + dy < H) &
                         (c + dx >= 0) & (c + dx < W)).astype(np.float32))
    m = np.stack(rows, 0)                      # (9, H*W)
    return np.tile(m, (1, block_n))            # (9, block_n*H*W)


def _fold_conv_bn_weight(w, bn_scale, cin_pad):
    """torch (Cout, Cin, 3, 3) conv weight * folded-BN scale ->
    (Cout, 9*cin_pad) matrix matching the in-kernel taps layout
    (tap-major, channel-minor, channels zero-padded to cin_pad)."""
    cout, cin, kh, kw = w.shape
    wt = jnp.transpose(w, (2, 3, 1, 0)).reshape(kh * kw, cin, cout)
    if cin_pad > cin:
        wt = jnp.pad(wt, ((0, 0), (0, cin_pad - cin), (0, 0)))
    wt = wt.reshape(kh * kw * cin_pad, cout)
    w2d = jnp.transpose(wt, (1, 0)).astype(jnp.float32)        # (Cout, 9*cin_pad)
    return w2d * bn_scale.reshape(cout, 1).astype(jnp.float32)


# -----------------------------------------------------------------------------
# fused SEWBlock kernel:
#   conv3x3(C->mid)+BN1+PLIF1 -> conv3x3(mid->C)+BN2+PLIF2 -> SEW connect
# -----------------------------------------------------------------------------
def _make_sew_kernel(*, W, HW, block_n, C, mid, cp1, cp2, v_th, connect_f):
    L = block_n * HW
    # flattened lane shift of each 3x3 tap (dy, dx)
    shifts = [dy * W + dx for dy in (-1, 0, 1) for dx in (-1, 0, 1)]

    def kernel(dec_ref, x_ref, w1_ref, b1_ref, w2_ref, b2_ref, m_ref,
               o_ref, taps1, v1, taps2, v2):
        t = pl.program_id(1)

        # reset membranes (and zero the padded tap rows) at the first step
        @pl.when(t == 0)
        def _init():
            if cp1 > C:
                taps1[...] = jnp.zeros_like(taps1)
            if cp2 > mid:
                taps2[...] = jnp.zeros_like(taps2)
            v1[...] = jnp.zeros_like(v1)
            v2[...] = jnp.zeros_like(v2)

        d1 = dec_ref[0]                       # sigmoid(w_plif1), SMEM scalar
        d2 = dec_ref[1]                       # sigmoid(w_plif2), SMEM scalar

        # wide input tile: (C, block_n*HW), images concatenated on the lane axis
        if block_n == 1:
            xw = x_ref[0, 0]
        else:
            xw = jnp.concatenate([x_ref[0, b] for b in range(block_n)], axis=-1)

        # hoisted per-tap boundary masks (center tap is all-ones -> skipped)
        mrows = [None if s == 0 else m_ref[k:k + 1, :]
                 for k, s in enumerate(shifts)]

        def im2col(src, taps_ref, cpad, csz):
            # 9 lane rotations of the wide tile; boundary masks zero exactly
            # the lanes where the circular roll crosses an image/row border.
            for k, s in enumerate(shifts):
                if s == 0:
                    tap = src
                else:
                    tap = pltpu.roll(src, (-s) % L, axis=1) * mrows[k]
                taps_ref[k * cpad:k * cpad + csz, :] = tap

        def plif(y, v_ref, decay):
            # decay_input=True, v_reset=0, hard reset
            v = v_ref[...] + (y - v_ref[...]) * decay
            spike = (v >= v_th).astype(jnp.float32)
            v_ref[...] = jnp.where(v >= v_th, 0.0, v)
            return spike

        # ---- conv3x3(C -> mid) + BN1 (scale folded into w1) + PLIF1 --------
        im2col(xw, taps1, cp1, C)
        y1 = jnp.dot(w1_ref[...], taps1[...],
                     preferred_element_type=jnp.float32) + b1_ref[...]
        s1 = plif(y1, v1, d1)                 # (mid, L) spikes, stays in VMEM/vregs

        # ---- conv3x3(mid -> C) + BN2 + PLIF2 --------------------------------
        im2col(s1, taps2, cp2, mid)
        y2 = jnp.dot(w2_ref[...], taps2[...],
                     preferred_element_type=jnp.float32) + b2_ref[...]
        s2 = plif(y2, v2, d2)                 # (C, L)

        # ---- SEW element-wise connect with the block input ------------------
        if connect_f == "ADD":
            res = s2 + xw
        elif connect_f == "AND":
            res = s2 * xw
        else:                                 # "IAND"
            res = xw * (1.0 - s2)
        res = res.astype(o_ref.dtype)

        if block_n == 1:
            o_ref[0, 0] = res
        else:
            for b in range(block_n):
                o_ref[0, b] = res[:, b * HW:(b + 1) * HW]

    return kernel


def sew_block_forward(x, params, connect_f="ADD"):
    """SEWBlock forward.  x: [T, N, C, H, W] (multi-step), returns same shape."""
    if connect_f not in ("ADD", "AND", "IAND"):
        raise NotImplementedError(connect_f)
    T, N, C, H, W = x.shape
    HW = H * W
    assert HW % 128 == 0, "H*W must be a multiple of 128 for lane-dense layout"
    mid = params["w1"].shape[0]
    assert params["w2"].shape == (C, mid, 3, 3)

    cp1 = _round_up(C, 8)                     # f32 sublane-padded channel stride
    cp2 = _round_up(mid, 8)
    block_n = _pick_block_n(N, C, mid, HW, cp1, cp2)
    n_blocks = N // block_n
    L = block_n * HW

    masks = jnp.asarray(_conv3x3_tap_masks(H, W, block_n), jnp.float32)  # (9, L)

    # BatchNorm scale folded into the conv weights host-side; bias stays.
    w1f = _fold_conv_bn_weight(params["w1"], params["bn1_scale"], cp1)   # (mid, 9*cp1)
    w2f = _fold_conv_bn_weight(params["w2"], params["bn2_scale"], cp2)   # (C, 9*cp2)
    b1 = params["bn1_bias"].reshape(mid, 1).astype(jnp.float32)
    b2 = params["bn2_bias"].reshape(C, 1).astype(jnp.float32)
    decays = jnp.stack([jax.nn.sigmoid(params["plif1_w"]),
                        jax.nn.sigmoid(params["plif2_w"])]).astype(jnp.float32)

    x4 = x.reshape(T, N, C, HW).astype(jnp.float32)

    kernel = _make_sew_kernel(W=W, HW=HW, block_n=block_n, C=C, mid=mid,
                              cp1=cp1, cp2=cp2, v_th=1.0, connect_f=connect_f)

    out = pl.pallas_call(
        kernel,
        out_shape=jax.ShapeDtypeStruct((T, N, C, HW), jnp.float32),
        grid_spec=pltpu.PrefetchScalarGridSpec(
            num_scalar_prefetch=0,
            grid=(n_blocks, T),               # T innermost: membranes carried in VMEM
            in_specs=[
                pl.BlockSpec(memory_space=pltpu.MemorySpace.SMEM),            # decays
                pl.BlockSpec((1, block_n, C, HW), lambda n, t: (t, n, 0, 0)),  # x
                pl.BlockSpec((mid, 9 * cp1), lambda n, t: (0, 0)),             # w1 (BN folded)
                pl.BlockSpec((mid, 1), lambda n, t: (0, 0)),                   # BN1 bias
                pl.BlockSpec((C, 9 * cp2), lambda n, t: (0, 0)),               # w2 (BN folded)
                pl.BlockSpec((C, 1), lambda n, t: (0, 0)),                     # BN2 bias
                pl.BlockSpec((9, L), lambda n, t: (0, 0)),                     # tap masks
            ],
            out_specs=pl.BlockSpec((1, block_n, C, HW), lambda n, t: (t, n, 0, 0)),
            scratch_shapes=[
                pltpu.VMEM((9 * cp1, L), jnp.float32),   # conv1 im2col taps
                pltpu.VMEM((mid, L), jnp.float32),       # PLIF1 membrane
                pltpu.VMEM((9 * cp2, L), jnp.float32),   # conv2 im2col taps
                pltpu.VMEM((C, L), jnp.float32),         # PLIF2 membrane
            ],
        ),
        compiler_params=pltpu.CompilerParams(
            dimension_semantics=("parallel", "arbitrary"),
            vmem_limit_bytes=48 * 1024 * 1024,
        ),
    )(decays, x4, w1f, b1, w2f, b2, masks)

    return out.reshape(T, N, C, H, W).astype(x.dtype)


def _make_bn_affine(kg, kb, km, kv, ch, eps=1e-5):
    gamma = 1.0 + 0.1 * jax.random.normal(kg, (ch,), jnp.float32)
    beta = 0.1 * jax.random.normal(kb, (ch,), jnp.float32)
    running_mean = 0.1 * jax.random.normal(km, (ch,), jnp.float32)
    running_var = jnp.abs(jax.random.normal(kv, (ch,), jnp.float32)) + 0.5
    scale = gamma / jnp.sqrt(running_var + eps)
    bias = beta - running_mean * scale
    return scale, bias


if __name__ == "__main__":
    key = jax.random.PRNGKey(0)
    T, N, C, H, W = 4, 2, 4, 16, 16           # [T, N, C, H, W]
    mid = 8

    ks = jax.random.split(key, 11)
    x = jax.random.normal(ks[0], (T, N, C, H, W), jnp.float32)

    # Conv weights in PyTorch (Cout, Cin, 3, 3) layout.
    w1 = (jax.random.normal(ks[1], (mid, C, 3, 3), jnp.float32)
          * math.sqrt(2.0 / (9 * C)))
    w2 = (jax.random.normal(ks[2], (C, mid, 3, 3), jnp.float32)
          * math.sqrt(2.0 / (9 * mid)))
    bn1_scale, bn1_bias = _make_bn_affine(ks[3], ks[4], ks[5], ks[6], mid)
    bn2_scale, bn2_bias = _make_bn_affine(ks[7], ks[8], ks[9], ks[10], C)

    params = dict(
        w1=w1, w2=w2,
        bn1_scale=bn1_scale, bn1_bias=bn1_bias,
        bn2_scale=bn2_scale, bn2_bias=bn2_bias,
        # ParametricLIF learnable w; init_tau=2.0 -> w = -log(tau-1) = 0
        plif1_w=jnp.zeros((), jnp.float32),
        plif2_w=jnp.zeros((), jnp.float32),
    )

    fwd = jax.jit(functools.partial(sew_block_forward, connect_f="ADD"))
    out = jax.block_until_ready(fwd(x, params))

    assert out.shape == (T, N, C, H, W) and out.dtype == jnp.float32
    assert bool(jnp.isfinite(out).all())
    # connect_f='ADD': out = spikes + x with spikes in {0, 1}
    d = np.asarray(out) - np.asarray(x)
    dr = np.rint(d)
    assert np.all(np.abs(d - dr) < 1e-3)
    assert np.all((dr == 0.0) | (dr == 1.0))
    print("KERNEL_OK")
</pallas_src>

<mosaic_0001>
module attributes {stable_mosaic.version = 11 : i64} {
  func.func @kernel(%arg0: i32, %arg1: i32, %arg2: memref<2xf32, #tpu.memory_space<smem>>, %arg3: memref<1x1x4x256xf32, #tpu.memory_space<vmem>>, %arg4: memref<8x72xf32, #tpu.memory_space<vmem>>, %arg5: memref<8x1xf32, #tpu.memory_space<vmem>>, %arg6: memref<4x72xf32, #tpu.memory_space<vmem>>, %arg7: memref<4x1xf32, #tpu.memory_space<vmem>>, %arg8: memref<9x256xf32, #tpu.memory_space<vmem>>, %arg9: memref<1x1x4x256xf32, #tpu.memory_space<vmem>>, %arg10: memref<72x256xf32, #tpu.memory_space<vmem>>, %arg11: memref<8x256xf32, #tpu.memory_space<vmem>>, %arg12: memref<72x256xf32, #tpu.memory_space<vmem>>, %arg13: memref<4x256xf32, #tpu.memory_space<vmem>>) attributes {dimension_semantics = [#tpu.dimension_semantics<parallel>, #tpu.dimension_semantics<arbitrary>], iteration_bounds = array<i64: 2, 4>, scalar_prefetch = 0 : i64, scratch_operands = 4 : i64, tpu.core_type = #tpu.core_type<tc>, window_params = [{transform_indices = @transform_0, window_bounds = array<i64: 2>}, {transform_indices = @transform_1, window_bounds = array<i64: 1, 1, 4, 256>}, {pipeline_mode = #tpu.pipeline_mode<synchronous>, transform_indices = @transform_2, window_bounds = array<i64: 8, 72>}, {pipeline_mode = #tpu.pipeline_mode<synchronous>, transform_indices = @transform_3, window_bounds = array<i64: 8, 1>}, {pipeline_mode = #tpu.pipeline_mode<synchronous>, transform_indices = @transform_4, window_bounds = array<i64: 4, 72>}, {pipeline_mode = #tpu.pipeline_mode<synchronous>, transform_indices = @transform_5, window_bounds = array<i64: 4, 1>}, {pipeline_mode = #tpu.pipeline_mode<synchronous>, transform_indices = @transform_6, window_bounds = array<i64: 9, 256>}, {transform_indices = @transform_7, window_bounds = array<i64: 1, 1, 4, 256>}]} {
    %c0_i32 = arith.constant 0 : i32
    %0 = arith.cmpi eq, %arg1, %c0_i32 : i32
    %1 = arith.extui %0 : i1 to i32
    %c0_i32_0 = arith.constant 0 : i32
    %2 = arith.cmpi ne, %1, %c0_i32_0 : i32
    scf.if %2 {
      %cst_87 = arith.constant 0.000000e+00 : f32
      %127 = vector.broadcast %cst_87 : f32 to vector<72x256xf32>
      %c0_88 = arith.constant 0 : index
      %c0_89 = arith.constant 0 : index
      %128 = vector.load %arg10[%c0_88, %c0_89] : memref<72x256xf32, #tpu.memory_space<vmem>>, vector<72x256xf32>
      tpu.vector_store %arg10[%c0_88, %c0_89], %127 {strides = array<i32>} : memref<72x256xf32, #tpu.memory_space<vmem>>, vector<72x256xf32>,
      %cst_90 = arith.constant 0.000000e+00 : f32
      %129 = vector.broadcast %cst_90 : f32 to vector<8x256xf32>
      %c0_91 = arith.constant 0 : index
      %c0_92 = arith.constant 0 : index
      %130 = vector.load %arg11[%c0_91, %c0_92] : memref<8x256xf32, #tpu.memory_space<vmem>>, vector<8x256xf32>
      tpu.vector_store %arg11[%c0_91, %c0_92], %129 {strides = array<i32>} : memref<8x256xf32, #tpu.memory_space<vmem>>, vector<8x256xf32>,
      %cst_93 = arith.constant 0.000000e+00 : f32
      %131 = vector.broadcast %cst_93 : f32 to vector<4x256xf32>
      %c0_94 = arith.constant 0 : index
      %c0_95 = arith.constant 0 : index
      %132 = vector.load %arg13[%c0_94, %c0_95] : memref<4x256xf32, #tpu.memory_space<vmem>>, vector<4x256xf32>
      tpu.vector_store %arg13[%c0_94, %c0_95], %131 {strides = array<i32>} : memref<4x256xf32, #tpu.memory_space<vmem>>, vector<4x256xf32>,
    } else {
    }
    %c0 = arith.constant 0 : index
    %3 = memref.load %arg2[%c0] : memref<2xf32, #tpu.memory_space<smem>>
    %c1 = arith.constant 1 : index
    %4 = memref.load %arg2[%c1] : memref<2xf32, #tpu.memory_space<smem>>
    %c0_1 = arith.constant 0 : index
    %c0_2 = arith.constant 0 : index
    %c0_3 = arith.constant 0 : index
    %c0_4 = arith.constant 0 : index
    %5 = vector.load %arg3[%c0_1, %c0_2, %c0_3, %c0_4] : memref<1x1x4x256xf32, #tpu.memory_space<vmem>>, vector<1x1x4x256xf32>
    %6 = vector.shape_cast %5 : vector<1x1x4x256xf32> to vector<4x256xf32>
    %c0_5 = arith.constant 0 : index
    %c0_6 = arith.constant 0 : index
    %7 = vector.load %arg8[%c0_5, %c0_6] : memref<9x256xf32, #tpu.memory_space<vmem>>, vector<1x256xf32>
    %c1_7 = arith.constant 1 : index
    %c0_8 = arith.constant 0 : index
    %8 = vector.load %arg8[%c1_7, %c0_8] : memref<9x256xf32, #tpu.memory_space<vmem>>, vector<1x256xf32>
    %c2 = arith.constant 2 : index
    %c0_9 = arith.constant 0 : index
    %9 = vector.load %arg8[%c2, %c0_9] : memref<9x256xf32, #tpu.memory_space<vmem>>, vector<1x256xf32>
    %c3 = arith.constant 3 : index
    %c0_10 = arith.constant 0 : index
    %10 = vector.load %arg8[%c3, %c0_10] : memref<9x256xf32, #tpu.memory_space<vmem>>, vector<1x256xf32>
    %c5 = arith.constant 5 : index
    %c0_11 = arith.constant 0 : index
    %11 = vector.load %arg8[%c5, %c0_11] : memref<9x256xf32, #tpu.memory_space<vmem>>, vector<1x256xf32>
    %c6 = arith.constant 6 : index
    %c0_12 = arith.constant 0 : index
    %12 = vector.load %arg8[%c6, %c0_12] : memref<9x256xf32, #tpu.memory_space<vmem>>, vector<1x256xf32>
    %c7 = arith.constant 7 : index
    %c0_13 = arith.constant 0 : index
    %13 = vector.load %arg8[%c7, %c0_13] : memref<9x256xf32, #tpu.memory_space<vmem>>, vector<1x256xf32>
    %c8 = arith.constant 8 : index
    %c0_14 = arith.constant 0 : index
    %14 = vector.load %arg8[%c8, %c0_14] : memref<9x256xf32, #tpu.memory_space<vmem>>, vector<1x256xf32>
    %c17_i32 = arith.constant 17 : i32
    %15 = tpu.dynamic_rotate %6 by %c17_i32 dim 1 : vector<4x256xf32>, i32 -> vector<4x256xf32>
    %16 = vector.broadcast %7 : vector<1x256xf32> to vector<4x256xf32>
    %17 = arith.mulf %15, %16 : vector<4x256xf32>
    %c0_15 = arith.constant 0 : index
    %c0_16 = arith.constant 0 : index
    %18 = vector.load %arg10[%c0_15, %c0_16] : memref<72x256xf32, #tpu.memory_space<vmem>>, vector<4x256xf32>
    tpu.vector_store %arg10[%c0_15, %c0_16], %17 {strides = array<i32>} : memref<72x256xf32, #tpu.memory_space<vmem>>, vector<4x256xf32>,
    %c16_i32 = arith.constant 16 : i32
    %19 = tpu.dynamic_rotate %6 by %c16_i32 dim 1 : vector<4x256xf32>, i32 -> vector<4x256xf32>
    %20 = vector.broadcast %8 : vector<1x256xf32> to vector<4x256xf32>
    %21 = arith.mulf %19, %20 : vector<4x256xf32>
    %c8_17 = arith.constant 8 : index
    %c0_18 = arith.constant 0 : index
    %22 = vector.load %arg10[%c8_17, %c0_18] : memref<72x256xf32, #tpu.memory_space<vmem>>, vector<4x256xf32>
    tpu.vector_store %arg10[%c8_17, %c0_18], %21 {strides = array<i32>} : memref<72x256xf32, #tpu.memory_space<vmem>>, vector<4x256xf32>,
    %c15_i32 = arith.constant 15 : i32
    %23 = tpu.dynamic_rotate %6 by %c15_i32 dim 1 : vector<4x256xf32>, i32 -> vector<4x256xf32>
    %24 = vector.broadcast %9 : vector<1x256xf32> to vector<4x256xf32>
    %25 = arith.mulf %23, %24 : vector<4x256xf32>
    %c16 = arith.constant 16 : index
    %c0_19 = arith.constant 0 : index
    %26 = vector.load %arg10[%c16, %c0_19] : memref<72x256xf32, #tpu.memory_space<vmem>>, vector<4x256xf32>
    tpu.vector_store %arg10[%c16, %c0_19], %25 {strides = array<i32>} : memref<72x256xf32, #tpu.memory_space<vmem>>, vector<4x256xf32>,
    %c1_i32 = arith.constant 1 : i32
    %27 = tpu.dynamic_rotate %6 by %c1_i32 dim 1 : vector<4x256xf32>, i32 -> vector<4x256xf32>
    %28 = vector.broadcast %10 : vector<1x256xf32> to vector<4x256xf32>
    %29 = arith.mulf %27, %28 : vector<4x256xf32>
    %c24 = arith.constant 24 : index
    %c0_20 = arith.constant 0 : index
    %30 = vector.load %arg10[%c24, %c0_20] : memref<72x256xf32, #tpu.memory_space<vmem>>, vector<4x256xf32>
    tpu.vector_store %arg10[%c24, %c0_20], %29 {strides = array<i32>} : memref<72x256xf32, #tpu.memory_space<vmem>>, vector<4x256xf32>,
    %c32 = arith.constant 32 : index
    %c0_21 = arith.constant 0 : index
    %31 = vector.load %arg10[%c32, %c0_21] : memref<72x256xf32, #tpu.memory_space<vmem>>, vector<4x256xf32>
    tpu.vector_store %arg10[%c32, %c0_21], %6 {strides = array<i32>} : memref<72x256xf32, #tpu.memory_space<vmem>>, vector<4x256xf32>,
    %c255_i32 = arith.constant 255 : i32
    %32 = tpu.dynamic_rotate %6 by %c255_i32 dim 1 : vector<4x256xf32>, i32 -> vector<4x256xf32>
    %33 = vector.broadcast %11 : vector<1x256xf32> to vector<4x256xf32>
    %34 = arith.mulf %32, %33 : vector<4x256xf32>
    %c40 = arith.constant 40 : index
    %c0_22 = arith.constant 0 : index
    %35 = vector.load %arg10[%c40, %c0_22] : memref<72x256xf32, #tpu.memory_space<vmem>>, vector<4x256xf32>
    tpu.vector_store %arg10[%c40, %c0_22], %34 {strides = array<i32>} : memref<72x256xf32, #tpu.memory_space<vmem>>, vector<4x256xf32>,
    %c241_i32 = arith.constant 241 : i32
    %36 = tpu.dynamic_rotate %6 by %c241_i32 dim 1 : vector<4x256xf32>, i32 -> vector<4x256xf32>
    %37 = vector.broadcast %12 : vector<1x256xf32> to vector<4x256xf32>
    %38 = arith.mulf %36, %37 : vector<4x256xf32>
    %c48 = arith.constant 48 : index
    %c0_23 = arith.constant 0 : index
    %39 = vector.load %arg10[%c48, %c0_23] : memref<72x256xf32, #tpu.memory_space<vmem>>, vector<4x256xf32>
    tpu.vector_store %arg10[%c48, %c0_23], %38 {strides = array<i32>} : memref<72x256xf32, #tpu.memory_space<vmem>>, vector<4x256xf32>,
    %c240_i32 = arith.constant 240 : i32
    %40 = tpu.dynamic_rotate %6 by %c240_i32 dim 1 : vector<4x256xf32>, i32 -> vector<4x256xf32>
    %41 = vector.broadcast %13 : vector<1x256xf32> to vector<4x256xf32>
    %42 = arith.mulf %40, %41 : vector<4x256xf32>
    %c56 = arith.constant 56 : index
    %c0_24 = arith.constant 0 : index
    %43 = vector.load %arg10[%c56, %c0_24] : memref<72x256xf32, #tpu.memory_space<vmem>>, vector<4x256xf32>
    tpu.vector_store %arg10[%c56, %c0_24], %42 {strides = array<i32>} : memref<72x256xf32, #tpu.memory_space<vmem>>, vector<4x256xf32>,
    %c239_i32 = arith.constant 239 : i32
    %44 = tpu.dynamic_rotate %6 by %c239_i32 dim 1 : vector<4x256xf32>, i32 -> vector<4x256xf32>
    %45 = vector.broadcast %14 : vector<1x256xf32> to vector<4x256xf32>
    %46 = arith.mulf %44, %45 : vector<4x256xf32>
    %c64 = arith.constant 64 : index
    %c0_25 = arith.constant 0 : index
    %47 = vector.load %arg10[%c64, %c0_25] : memref<72x256xf32, #tpu.memory_space<vmem>>, vector<4x256xf32>
    tpu.vector_store %arg10[%c64, %c0_25], %46 {strides = array<i32>} : memref<72x256xf32, #tpu.memory_space<vmem>>, vector<4x256xf32>,
    %c0_26 = arith.constant 0 : index
    %c0_27 = arith.constant 0 : index
    %48 = vector.load %arg4[%c0_26, %c0_27] : memref<8x72xf32, #tpu.memory_space<vmem>>, vector<8x72xf32>
    %c0_28 = arith.constant 0 : index
    %c0_29 = arith.constant 0 : index
    %49 = vector.load %arg10[%c0_28, %c0_29] : memref<72x256xf32, #tpu.memory_space<vmem>>, vector<72x256xf32>
    %cst = arith.constant dense<0.000000e+00> : vector<8x256xf32>
    %50 = tpu.matmul %48, %49, %cst {dimension_numbers = #tpu.dot_dimension_numbers<[1], [0], [0], [1], [0, 0, 1, 1], [], []>} : vector<8x72xf32>, vector<72x256xf32>, vector<8x256xf32> -> vector<8x256xf32>
    %c0_30 = arith.constant 0 : index
    %c0_31 = arith.constant 0 : index
    %51 = vector.load %arg5[%c0_30, %c0_31] : memref<8x1xf32, #tpu.memory_space<vmem>>, vector<8x1xf32>
    %52 = vector.broadcast %51 : vector<8x1xf32> to vector<8x256xf32>
    %53 = arith.addf %50, %52 : vector<8x256xf32>
    %c0_32 = arith.constant 0 : index
    %c0_33 = arith.constant 0 : index
    %54 = vector.load %arg11[%c0_32, %c0_33] : memref<8x256xf32, #tpu.memory_space<vmem>>, vector<8x256xf32>
    %c0_34 = arith.constant 0 : index
    %c0_35 = arith.constant 0 : index
    %55 = vector.load %arg11[%c0_34, %c0_35] : memref<8x256xf32, #tpu.memory_space<vmem>>, vector<8x256xf32>
    %56 = arith.subf %53, %55 : vector<8x256xf32>
    %57 = vector.broadcast %3 : f32 to vector<8x256xf32>
    %58 = arith.mulf %56, %57 : vector<8x256xf32>
    %59 = arith.addf %54, %58 : vector<8x256xf32>
    %cst_36 = arith.constant 1.000000e+00 : f32
    %60 = vector.broadcast %cst_36 : f32 to vector<8x256xf32>
    %61 = arith.cmpf oge, %59, %60 : vector<8x256xf32>
    %62 = arith.extui %61 : vector<8x256xi1> to vector<8x256xi32>
    %63 = arith.sitofp %62 : vector<8x256xi32> to vector<8x256xf32>
    %cst_37 = arith.constant 1.000000e+00 : f32
    %64 = vector.broadcast %cst_37 : f32 to vector<8x256xf32>
    %65 = arith.cmpf oge, %59, %64 : vector<8x256xf32>
    %cst_38 = arith.constant 0.000000e+00 : f32
    %66 = vector.broadcast %cst_38 : f32 to vector<8x256xf32>
    %67 = arith.select %65, %66, %59 : vector<8x256xi1>, vector<8x256xf32>
    %c0_39 = arith.constant 0 : index
    %c0_40 = arith.constant 0 : index
    %68 = vector.load %arg11[%c0_39, %c0_40] : memref<8x256xf32, #tpu.memory_space<vmem>>, vector<8x256xf32>
    tpu.vector_store %arg11[%c0_39, %c0_40], %67 {strides = array<i32>} : memref<8x256xf32, #tpu.memory_space<vmem>>, vector<8x256xf32>,
    %c17_i32_41 = arith.constant 17 : i32
    %69 = tpu.dynamic_rotate %63 by %c17_i32_41 dim 1 : vector<8x256xf32>, i32 -> vector<8x256xf32>
    %70 = vector.broadcast %7 : vector<1x256xf32> to vector<8x256xf32>
    %71 = arith.mulf %69, %70 : vector<8x256xf32>
    %c0_42 = arith.constant 0 : index
    %c0_43 = arith.constant 0 : index
    %72 = vector.load %arg12[%c0_42, %c0_43] : memref<72x256xf32, #tpu.memory_space<vmem>>, vector<8x256xf32>
    tpu.vector_store %arg12[%c0_42, %c0_43], %71 {strides = array<i32>} : memref<72x256xf32, #tpu.memory_space<vmem>>, vector<8x256xf32>,
    %c16_i32_44 = arith.constant 16 : i32
    %73 = tpu.dynamic_rotate %63 by %c16_i32_44 dim 1 : vector<8x256xf32>, i32 -> vector<8x256xf32>
    %74 = vector.broadcast %8 : vector<1x256xf32> to vector<8x256xf32>
    %75 = arith.mulf %73, %74 : vector<8x256xf32>
    %c8_45 = arith.constant 8 : index
    %c0_46 = arith.constant 0 : index
    %76 = vector.load %arg12[%c8_45, %c0_46] : memref<72x256xf32, #tpu.memory_space<vmem>>, vector<8x256xf32>
    tpu.vector_store %arg12[%c8_45, %c0_46], %75 {strides = array<i32>} : memref<72x256xf32, #tpu.memory_space<vmem>>, vector<8x256xf32>,
    %c15_i32_47 = arith.constant 15 : i32
    %77 = tpu.dynamic_rotate %63 by %c15_i32_47 dim 1 : vector<8x256xf32>, i32 -> vector<8x256xf32>
    %78 = vector.broadcast %9 : vector<1x256xf32> to vector<8x256xf32>
    %79 = arith.mulf %77, %78 : vector<8x256xf32>
    %c16_48 = arith.constant 16 : index
    %c0_49 = arith.constant 0 : index
    %80 = vector.load %arg12[%c16_48, %c0_49] : memref<72x256xf32, #tpu.memory_space<vmem>>, vector<8x256xf32>
    tpu.vector_store %arg12[%c16_48, %c0_49], %79 {strides = array<i32>} : memref<72x256xf32, #tpu.memory_space<vmem>>, vector<8x256xf32>,
    %c1_i32_50 = arith.constant 1 : i32
    %81 = tpu.dynamic_rotate %63 by %c1_i32_50 dim 1 : vector<8x256xf32>, i32 -> vector<8x256xf32>
    %82 = vector.broadcast %10 : vector<1x256xf32> to vector<8x256xf32>
    %83 = arith.mulf %81, %82 : vector<8x256xf32>
    %c24_51 = arith.constant 24 : index
    %c0_52 = arith.constant 0 : index
    %84 = vector.load %arg12[%c24_51, %c0_52] : memref<72x256xf32, #tpu.memory_space<vmem>>, vector<8x256xf32>
    tpu.vector_store %arg12[%c24_51, %c0_52], %83 {strides = array<i32>} : memref<72x256xf32, #tpu.memory_space<vmem>>, vector<8x256xf32>,
    %c32_53 = arith.constant 32 : index
    %c0_54 = arith.constant 0 : index
    %85 = vector.load %arg12[%c32_53, %c0_54] : memref<72x256xf32, #tpu.memory_space<vmem>>, vector<8x256xf32>
    tpu.vector_store %arg12[%c32_53, %c0_54], %63 {strides = array<i32>} : memref<72x256xf32, #tpu.memory_space<vmem>>, vector<8x256xf32>,
    %c255_i32_55 = arith.constant 255 : i32
    %86 = tpu.dynamic_rotate %63 by %c255_i32_55 dim 1 : vector<8x256xf32>, i32 -> vector<8x256xf32>
    %87 = vector.broadcast %11 : vector<1x256xf32> to vector<8x256xf32>
    %88 = arith.mulf %86, %87 : vector<8x256xf32>
    %c40_56 = arith.constant 40 : index
    %c0_57 = arith.constant 0 : index
    %89 = vector.load %arg12[%c40_56, %c0_57] : memref<72x256xf32, #tpu.memory_space<vmem>>, vector<8x256xf32>
    tpu.vector_store %arg12[%c40_56, %c0_57], %88 {strides = array<i32>} : memref<72x256xf32, #tpu.memory_space<vmem>>, vector<8x256xf32>,
    %c241_i32_58 = arith.constant 241 : i32
    %90 = tpu.dynamic_rotate %63 by %c241_i32_58 dim 1 : vector<8x256xf32>, i32 -> vector<8x256xf32>
    %91 = vector.broadcast %12 : vector<1x256xf32> to vector<8x256xf32>
    %92 = arith.mulf %90, %91 : vector<8x256xf32>
    %c48_59 = arith.constant 48 : index
    %c0_60 = arith.constant 0 : index
    %93 = vector.load %arg12[%c48_59, %c0_60] : memref<72x256xf32, #tpu.memory_space<vmem>>, vector<8x256xf32>
    tpu.vector_store %arg12[%c48_59, %c0_60], %92 {strides = array<i32>} : memref<72x256xf32, #tpu.memory_space<vmem>>, vector<8x256xf32>,
    %c240_i32_61 = arith.constant 240 : i32
    %94 = tpu.dynamic_rotate %63 by %c240_i32_61 dim 1 : vector<8x256xf32>, i32 -> vector<8x256xf32>
    %95 = vector.broadcast %13 : vector<1x256xf32> to vector<8x256xf32>
    %96 = arith.mulf %94, %95 : vector<8x256xf32>
    %c56_62 = arith.constant 56 : index
    %c0_63 = arith.constant 0 : index
    %97 = vector.load %arg12[%c56_62, %c0_63] : memref<72x256xf32, #tpu.memory_space<vmem>>, vector<8x256xf32>
    tpu.vector_store %arg12[%c56_62, %c0_63], %96 {strides = array<i32>} : memref<72x256xf32, #tpu.memory_space<vmem>>, vector<8x256xf32>,
    %c239_i32_64 = arith.constant 239 : i32
    %98 = tpu.dynamic_rotate %63 by %c239_i32_64 dim 1 : vector<8x256xf32>, i32 -> vector<8x256xf32>
    %99 = vector.broadcast %14 : vector<1x256xf32> to vector<8x256xf32>
    %100 = arith.mulf %98, %99 : vector<8x256xf32>
    %c64_65 = arith.constant 64 : index
    %c0_66 = arith.constant 0 : index
    %101 = vector.load %arg12[%c64_65, %c0_66] : memref<72x256xf32, #tpu.memory_space<vmem>>, vector<8x256xf32>
    tpu.vector_store %arg12[%c64_65, %c0_66], %100 {strides = array<i32>} : memref<72x256xf32, #tpu.memory_space<vmem>>, vector<8x256xf32>,
    %c0_67 = arith.constant 0 : index
    %c0_68 = arith.constant 0 : index
    %102 = vector.load %arg6[%c0_67, %c0_68] : memref<4x72xf32, #tpu.memory_space<vmem>>, vector<4x72xf32>
    %c0_69 = arith.constant 0 : index
    %c0_70 = arith.constant 0 : index
    %103 = vector.load %arg12[%c0_69, %c0_70] : memref<72x256xf32, #tpu.memory_space<vmem>>, vector<72x256xf32>
    %cst_71 = arith.constant dense<0.000000e+00> : vector<4x256xf32>
    %104 = tpu.matmul %102, %103, %cst_71 {dimension_numbers = #tpu.dot_dimension_numbers<[1], [0], [0], [1], [0, 0, 1, 1], [], []>} : vector<4x72xf32>, vector<72x256xf32>, vector<4x256xf32> -> vector<4x256xf32>
    %c0_72 = arith.constant 0 : index
    %c0_73 = arith.constant 0 : index
    %105 = vector.load %arg7[%c0_72, %c0_73] : memref<4x1xf32, #tpu.memory_space<vmem>>, vector<4x1xf32>
    %106 = vector.broadcast %105 : vector<4x1xf32> to vector<4x256xf32>
    %107 = arith.addf %104, %106 : vector<4x256xf32>
    %c0_74 = arith.constant 0 : index
    %c0_75 = arith.constant 0 : index
    %108 = vector.load %arg13[%c0_74, %c0_75] : memref<4x256xf32, #tpu.memory_space<vmem>>, vector<4x256xf32>
    %c0_76 = arith.constant 0 : index
    %c0_77 = arith.constant 0 : index
    %109 = vector.load %arg13[%c0_76, %c0_77] : memref<4x256xf32, #tpu.memory_space<vmem>>, vector<4x256xf32>
    %110 = arith.subf %107, %109 : vector<4x256xf32>
    %111 = vector.broadcast %4 : f32 to vector<4x256xf32>
    %112 = arith.mulf %110, %111 : vector<4x256xf32>
    %113 = arith.addf %108, %112 : vector<4x256xf32>
    %cst_78 = arith.constant 1.000000e+00 : f32
    %114 = vector.broadcast %cst_78 : f32 to vector<4x256xf32>
    %115 = arith.cmpf oge, %113, %114 : vector<4x256xf32>
    %116 = arith.extui %115 : vector<4x256xi1> to vector<4x256xi32>
    %117 = arith.sitofp %116 : vector<4x256xi32> to vector<4x256xf32>
    %cst_79 = arith.constant 1.000000e+00 : f32
    %118 = vector.broadcast %cst_79 : f32 to vector<4x256xf32>
    %119 = arith.cmpf oge, %113, %118 : vector<4x256xf32>
    %cst_80 = arith.constant 0.000000e+00 : f32
    %120 = vector.broadcast %cst_80 : f32 to vector<4x256xf32>
    %121 = arith.select %119, %120, %113 : vector<4x256xi1>, vector<4x256xf32>
    %c0_81 = arith.constant 0 : index
    %c0_82 = arith.constant 0 : index
    %122 = vector.load %arg13[%c0_81, %c0_82] : memref<4x256xf32, #tpu.memory_space<vmem>>, vector<4x256xf32>
    tpu.vector_store %arg13[%c0_81, %c0_82], %121 {strides = array<i32>} : memref<4x256xf32, #tpu.memory_space<vmem>>, vector<4x256xf32>,
    %123 = arith.addf %117, %6 : vector<4x256xf32>
    %c0_83 = arith.constant 0 : index
    %c0_84 = arith.constant 0 : index
    %c0_85 = arith.constant 0 : index
    %c0_86 = arith.constant 0 : index
    %124 = vector.load %arg9[%c0_83, %c0_84, %c0_85, %c0_86] : memref<1x1x4x256xf32, #tpu.memory_space<vmem>>, vector<1x1x4x256xf32>
    %125 = vector.shape_cast %124 : vector<1x1x4x256xf32> to vector<4x256xf32>
    %126 = vector.shape_cast %123 : vector<4x256xf32> to vector<1x1x4x256xf32>
    tpu.vector_store %arg9[%c0_83, %c0_84, %c0_85, %c0_86], %126 {strides = array<i32>} : memref<1x1x4x256xf32, #tpu.memory_space<vmem>>, vector<1x1x4x256xf32>,
    return
  }
  func.func @transform_0(%arg0: i32, %arg1: i32) -> i32 {
    %c0_i32 = arith.constant 0 : i32
    %c0_i32_0 = arith.constant 0 : i32
    return %c0_i32 : i32
  }
  func.func @transform_1(%arg0: i32, %arg1: i32) -> (i32, i32, i32, i32) {
    %c0_i32 = arith.constant 0 : i32
    %c0_i32_0 = arith.constant 0 : i32
    %c0_i32_1 = arith.constant 0 : i32
    return %arg1, %arg0, %c0_i32, %c0_i32_0 : i32, i32, i32, i32
  }
  func.func @transform_2(%arg0: i32, %arg1: i32) -> (i32, i32) {
    %c0_i32 = arith.constant 0 : i32
    %c0_i32_0 = arith.constant 0 : i32
    %c0_i32_1 = arith.constant 0 : i32
    return %c0_i32, %c0_i32_0 : i32, i32
  }
  func.func @transform_3(%arg0: i32, %arg1: i32) -> (i32, i32) {
    %c0_i32 = arith.constant 0 : i32
    %c0_i32_0 = arith.constant 0 : i32
    %c0_i32_1 = arith.constant 0 : i32
    return %c0_i32, %c0_i32_0 : i32, i32
  }
  func.func @transform_4(%arg0: i32, %arg1: i32) -> (i32, i32) {
    %c0_i32 = arith.constant 0 : i32
    %c0_i32_0 = arith.constant 0 : i32
    %c0_i32_1 = arith.constant 0 : i32
    return %c0_i32, %c0_i32_0 : i32, i32
  }
  func.func @transform_5(%arg0: i32, %arg1: i32) -> (i32, i32) {
    %c0_i32 = arith.constant 0 : i32
    %c0_i32_0 = arith.constant 0 : i32
    %c0_i32_1 = arith.constant 0 : i32
    return %c0_i32, %c0_i32_0 : i32, i32
  }
  func.func @transform_6(%arg0: i32, %arg1: i32) -> (i32, i32) {
    %c0_i32 = arith.constant 0 : i32
    %c0_i32_0 = arith.constant 0 : i32
    %c0_i32_1 = arith.constant 0 : i32
    return %c0_i32, %c0_i32_0 : i32, i32
  }
  func.func @transform_7(%arg0: i32, %arg1: i32) -> (i32, i32, i32, i32) {
    %c0_i32 = arith.constant 0 : i32
    %c0_i32_0 = arith.constant 0 : i32
    %c0_i32_1 = arith.constant 0 : i32
    return %arg1, %arg0, %c0_i32, %c0_i32_0 : i32, i32, i32, i32
  }
}

</mosaic_0001>

<bundles_post_ra>
// kernel: sew_block_forward.1
= control target key start
LH: loop header
LB: loop body
LE: loop exit
PB: predicated region body
PF: predicated region fallthrough
CT: control target
= control target key end

     0   :  { %12 = vsyncpa [#allocation7], 0  ;;  %s1269_s24 = smov 0   ;;  %s1271_s25 = smov 0   ;;  %s1613_s0 = inlined_call_operand.vmem [shape: f32[2], index: 0, kind: input, shape index: {}]   ;;  %s1614_s1 = inlined_call_operand.vmem [shape: f32[4,2,4,256], index: 1, kind: input, shape index: {}]   ;;  %s1615_s2 = inlined_call_operand.vmem [shape: f32[8,72], index: 2, kind: input, shape index: {}]   ;;  %s1616_s3 = inlined_call_operand.vmem [shape: f32[8,1], index: 3, kind: input, shape index: {}]   ;;  %s1617_s4 = inlined_call_operand.vmem [shape: f32[4,72], index: 4, kind: input, shape index: {}]   ;;  %s1618_s5 = inlined_call_operand.vmem [shape: f32[4,1], index: 5, kind: input, shape index: {}]   ;;  %s1619_s6 = inlined_call_operand.vmem [shape: f32[9,256], index: 6, kind: input, shape index: {}]   ;;  %s1620_s7 = inlined_call_operand.vmem [shape: f32[4,2,4,256], index: 7, kind: output, shape index: {}]  }
   0x1   :  { %s1273_s26 = smov 0   ;;  %s1275_s27 = smov 0  }
   0x2   :  { %s1277_s28 = smov 0  }
   0x3 LB: > { %s984_s29 = sadd.s32 4294967295, %s1213_s28   ;;  %s27_s30 = sadd.s32 1, %s1205_s26  ;;  %s1213_s28 = sphi %s1277_s28, %s18_s28   ;;  %s1209_s27 = sphi %s1275_s27, %s1626_s27   ;;  %s1205_s26 = sphi %s1273_s26, %s1625_s26   ;;  %s1201_s25 = sphi %s1271_s25, %s1624_s25   ;;  %s1197_s24 = sphi %s1269_s24, %s1623_s24  }
   0x4   : > { %p28_p0 = scmp.ge.s32.totalorder %s27_s30, 4  ;;  %s30_s8 = sadd.s32 1, %s1209_s27 }
   0x5   : > { %p986_p1 = scmp.ge.s32.totalorder %s1213_s28, 1  ;;  %p217_p2 = scmp.lt.s32.totalorder %s1213_s28, 9 }
   0x6   : > { %s1628_s30 = smov (%p28_p0, %s27_s30), 0  ;;  %s1630_s8 = smov (!%p28_p0, %s30_s8), %s1209_s27 }
   0x7   : > { %p1302_p3 = pnand %p986_p1, %p217_p2  ;;  %p32_p4 = scmp.ge.s32.totalorder %s1630_s8, 2 }
   0x8   : > { %p1306_p5 = scmp.eq.s32.totalorder %s984_s29, 0  ;;  %s230_s13 = sshll.u32 %s1613_s0, 4  ;;  %s231_s13 = int_to_ptr.vmem [resolvable:$true] %s230_s13 }
   0x9   : > { %p1053_p6 = pneg %p1302_p3  ;;  %s1632_s8 = smov (%p32_p4, %s1630_s8), 0 }
   0xa   : > { %s1156_s14 = scalar_lea.vmem %s231_s13, 16  ;;  %p1164_p12 = scmp.lt.s32.totalorder %s231_s13, %s231_s13 }
   0xb   : > { %p1054_p7 = pnand %p1306_p5, %p1053_p6  ;;  %p1157_p8 = scmp.ne.s32.totalorder %s231_s13, %s1156_s14 }
   0xc   : > { %p1165_p13 = scmp.lt.s32.totalorder %s1156_s14, %s1156_s14 }
   0xd   : > { %p1158_p9 = pneg %p1054_p7 }
   0xe   : > { %p1166_p0 = por %p1165_p13, %p1164_p12 }
   0xf   : > { %p1159_p10 = pnand %p1158_p9, %p1157_p8 }
  0x11   : > { %p1160_p11 = pneg %p1159_p10 }
  0x13   : > { %p1167_p1 = pnand %p1166_p0, %p1160_p11 }
  0x15   : > { %1170 = shalt.err (!%p1167_p1)
}
  0x16   : > { %s1215_s15 = smov [#allocation6]   ;;  %270 = sbr.rel (%p1302_p3) target bundleno = 804 (0x324), region = 48 }
  0x17   : > { %1056 = dma.vmem_to_smem (!%p1054_p7), %s231_s13, 16, %s1215_s15, [#allocation7]  }
  0x1d   : > { %1192 = dma.done.wait (%p1306_p5), [#allocation7], 16  }
  0x1e   : > { %1194 = vsyncadd (%p1306_p5), [#allocation7], 4294967280 }
  0x1f   : > { %276 = sfence }
  0x20   : > { %p311_p2 = scmp.lt.s32.totalorder %s1197_s24, 3  ;;  %p313_p4 = scmp.lt.s32.totalorder %s1201_s25, 1 }
  0x21   : > { %p997_p3 = scmp.ne.s32.totalorder %s1197_s24, 0 }
  0x22   : > { %s312_s16 = scalar_select %p311_p2, %s1197_s24, 3 }
  0x23   : > { %s1634_s25 = smov (!%p313_p4, %s1201_s25), 1  ;;  %332 = sbr.rel (%p997_p3) target bundleno = 48 (0x30), region = 56 }
  0x24   : > { %s992_s17 = sshll.u32 %s312_s16, 2  ;;  %s991_s18 = sshll.u32 %s1634_s25, 1  ;;  %v1216_v0 = vmov (!%p997_p3), 0.0  }
  0x25   : > { %s317_s19 = sadd.s32 %s992_s17, %s991_s18  ;;  %333 = vst [vmem:[#allocation2] sm:$0xff] (!%p997_p3), %v1216_v0  ;;  %334 = vst [vmem:[#allocation2 + $0x8] sm:$0xff] (!%p997_p3), %v1216_v0 }
  0x26   : > { %s993_s20 = sshll.u32 %s317_s19, 2  ;;  %335 = vst [vmem:[#allocation2 + $0x10] sm:$0xff] (!%p997_p3), %v1216_v0  ;;  %336 = vst [vmem:[#allocation2 + $0x18] sm:$0xff] (!%p997_p3), %v1216_v0 }
  0x27   : > { %s319_s23 = scalar_lea.vmem %s1614_s1, %s993_s20  ;;  %s1335_s10 = scalar_lea.vmem %s1620_s7, %s993_s20  ;;  %337 = vst [vmem:[#allocation2 + $0x20] sm:$0xff] (!%p997_p3), %v1216_v0  ;;  %338 = vst [vmem:[#allocation2 + $0x28] sm:$0xff] (!%p997_p3), %v1216_v0 }
  0x28   : > { %339 = vst [vmem:[#allocation2 + $0x30] sm:$0xff] (!%p997_p3), %v1216_v0  ;;  %340 = vst [vmem:[#allocation2 + $0x38] sm:$0xff] (!%p997_p3), %v1216_v0 }
  0x29   : > { %341 = vst [vmem:[#allocation2 + $0x40] sm:$0xff] (!%p997_p3), %v1216_v0  ;;  %342 = vst [vmem:[#allocation2 + $0x48] sm:$0xff] (!%p997_p3), %v1216_v0 }
  0x2a   : > { %343 = vst [vmem:[#allocation2 + $0x50] sm:$0xff] %v1216_v0  ;;  %344 = vst [vmem:[#allocation2 + $0x58] sm:$0xff] %v1216_v0 }
  0x2b   : > { %345 = vst [vmem:[#allocation2 + $0x60] sm:$0xff] %v1216_v0  ;;  %346 = vst [vmem:[#allocation2 + $0x68] sm:$0xff] %v1216_v0 }
  0x2c   : > { %347 = vst [vmem:[#allocation2 + $0x70] sm:$0xff] %v1216_v0  ;;  %348 = vst [vmem:[#allocation2 + $0x78] sm:$0xff] %v1216_v0 }
  0x2d   : > { %349 = vst [vmem:[#allocation2 + $0x80] sm:$0xff] %v1216_v0  ;;  %350 = vst [vmem:[#allocation2 + $0x88] sm:$0xff] %v1216_v0 }
  0x2e   : > { %351 = vst [vmem:[#allocation3] sm:$0xff] %v1216_v0  ;;  %352 = vst [vmem:[#allocation3 + $0x8] sm:$0xff] %v1216_v0 }
  0x2f   : > { %353 = vst [vmem:[#allocation5] sm:$0xff] %v1216_v0 }
  0x30 PF: > { %v1338_v1 = vld [vmem:[%s319_s23] sm:$0xff]  ;;  %s1217_s24 = smov 16   ;;  %s1218_s25 = smov 17   ;;  %v1225_v3 = vmov 0.0   ;;  %v1226_v5 = vmov 0   ;;  %v379_v6 = vlaneseq  ;;  %vm580_vm8 = vcmask 588800  }
  0x31   : > { %399 = vrot.lane.b32.xlu1 %v1338_v1, %s1217_s24  ;;  %465 = vst [vmem:[#allocation2 + $0x40] sm:$0xf] %v1338_v1  ;;  %375 = vrot.lane.b32.xlu0 %v1338_v1, %s1218_s25  ;;  %v373_v2 = vcombine.high %v1338_v1, %v1338_v1  ;;  %s1219_s11 = smov 15   ;;  %s1220_s12 = smov 1   ;;  %v574_v4 = vld [vmem:[%s1616_s3] sm:$0xff]  ;;  %vm1228_vm11 = vmmov 1  }
  0x32   : > { %s1221_s13 = smov 127   ;;  %s1222_s14 = smov 113   ;;  %648 = vmatprep.mubr.f32.mxu0 %v1225_v3  ;;  %848 = vmatprep.mubr.f32.mxu1 %v1225_v3  ;;  %v386_v7 = vshrl.u32 %v379_v6, 7  ;;  %v1372_v8 = vand.u32 127, %v379_v6 }
  0x33   : > { %466 = vst [vmem:[#allocation2 + $0x48] sm:$0xf] %v373_v2  ;;  %s1223_s15 = smov 112   ;;  %s1224_s16 = smov 111   ;;  %1113 = vset.pattern.permute.xlu0 %v1226_v5 }
  0x34   : > { %v1374_v9 = vsub.s32 0, %v386_v7  ;;  %v1376_v10 = vsub.s32 1, %v386_v7  ;;  %v999_v11 = vld [vmem:[%s1619_s6 + $0x1] ss:$8 sm:$0x3]  ;;  %vm403_vm0 = vcmp.lt.s32.totalorder %v1372_v8, 16 }
  0x35   : > { %401 = vrot.lane.b32.xlu1 %v373_v2, %s1217_s24  ;;  %377 = vrot.lane.b32.xlu0 %v373_v2, %s1218_s25  ;;  %v357_v12 = vld [vmem:[%s1619_s6] ss:$8 sm:$0x3]  ;;  %vm381_vm1 = vcmp.lt.s32.totalorder %v1372_v8, 17  ;;  %vm425_vm2 = vcmp.lt.s32.totalorder %v1372_v8, 15  ;;  %vm447_vm3 = vcmp.lt.s32.totalorder %v1372_v8, 1 }
  0x36   : > { %v1000_v15 = vld [vmem:[%s1619_s6 + $0x2] ss:$8 sm:$0x3]  ;;  %v1390_v16 = vrot.slane %v999_v11, %v1374_v9  ;;  %v1393_v17 = vrot.slane %v999_v11, %v1376_v10  ;;  %v1396_v18 = vrot.slane %v357_v12, %v1374_v9  ;;  %v1399_v19 = vrot.slane %v357_v12, %v1376_v10  ;;  %v1001_v32 = vld [vmem:[%s1619_s6 + $0x3] ss:$8 sm:$0x3] }
  0x37   : > { %v1403_v22 = vrot.slane %v1000_v15, %v1374_v9  ;;  %v1406_v23 = vrot.slane %v1000_v15, %v1376_v10  ;;  %v1431_v39 = vrot.slane %v1001_v32, %v1374_v9  ;;  %v1434_v40 = vrot.slane %v1001_v32, %v1376_v10  ;;  %v1002_v41 = vld [vmem:[%s1619_s6 + $0x5] ss:$8 sm:$0x3]  ;;  %v1003_v50 = vld [vmem:[%s1619_s6 + $0x6] ss:$8 sm:$0x3] }
  0x38   : > { %vm471_vm4 = vcmp.lt.s32.totalorder %v1372_v8, 127  ;;  %v1447_v48 = vrot.slane %v1002_v41, %v1374_v9  ;;  %v1450_v49 = vrot.slane %v1002_v41, %v1376_v10  ;;  %vm493_vm5 = vcmp.lt.s32.totalorder %v1372_v8, 113  ;;  %s354_s19 = sld [smem:[#allocation6]] }
  0x39   : > { %423 = vrot.lane.b32.xlu1 %v373_v2, %s1219_s11  ;;  %421 = vrot.lane.b32.xlu0 %v1338_v1, %s1219_s11  ;;  %v1463_v63 = vrot.slane %v1003_v50, %v1374_v9  ;;  %v1466_v0 = vrot.slane %v1003_v50, %v1376_v10  ;;  %vm515_vm6 = vcmp.lt.s32.totalorder %v1372_v8, 112  ;;  %vm537_vm7 = vcmp.lt.s32.totalorder %v1372_v8, 111 }
  0x3a   : > { %v565_v32 = vld [vmem:[#allocation2 + $0x48] sm:$0xff] }
  0x3d   : > { %445 = vrot.lane.b32.xlu1 %v373_v2, %s1220_s12  ;;  %443 = vrot.lane.b32.xlu0 %v1338_v1, %s1220_s12 }
  0x41   : > { %469 = vrot.lane.b32.xlu1 %v373_v2, %s1221_s13  ;;  %467 = vrot.lane.b32.xlu0 %v1338_v1, %s1221_s13 }
  0x45   : > { %491 = vrot.lane.b32.xlu1 %v373_v2, %s1222_s14  ;;  %489 = vrot.lane.b32.xlu0 %v1338_v1, %s1222_s14 }
  0x49   : > { %513 = vrot.lane.b32.xlu1 %v373_v2, %s1223_s15  ;;  %511 = vrot.lane.b32.xlu0 %v1338_v1, %s1223_s15 }
  0x4d   : > { %535 = vrot.lane.b32.xlu1 %v373_v2, %s1224_s16  ;;  %533 = vrot.lane.b32.xlu0 %v1338_v1, %s1224_s16  ;;  %v1004_v2 = vld [vmem:[%s1619_s6 + $0x7] ss:$8 sm:$0x3] }
  0x51   : > { %577 = vperm.xlu0 %1113, %v574_v4  }
  0xa3   : > { %v400_v13 = vpop.permute.xlu1 %399  ;;  %v376_v14 = vpop.permute.xlu0 %375 }
  0xa7   : > { %v402_v20 = vpop.permute.xlu1 %401  ;;  %v378_v21 = vpop.permute.xlu0 %377 }
  0xa8   : > { %v404_v24 = vsel %vm403_vm0, %v400_v13, %v402_v20  ;;  %v405_v25 = vsel %vm403_vm0, %v402_v20, %v400_v13  ;;  %v382_v26 = vsel %vm381_vm1, %v376_v14, %v378_v21  ;;  %v383_v27 = vsel %vm381_vm1, %v378_v21, %v376_v14  ;;  %v1005_v20 = vld [vmem:[%s1619_s6 + $0x10] ss:$8 sm:$0x3] }
  0xa9   : > { %v417_v28 = vmul.f32 %v1390_v16, %v405_v25  ;;  %v418_v29 = vmul.f32 %v1393_v17, %v404_v24  ;;  %v395_v30 = vmul.f32 %v1396_v18, %v383_v27  ;;  %v396_v31 = vmul.f32 %v1399_v19, %v382_v26 }
  0xaa   : > { %v1479_v13 = vrot.slane %v1004_v2, %v1374_v9  ;;  %v1482_v14 = vrot.slane %v1004_v2, %v1376_v10 }
  0xab   : > { %419 = vst [vmem:[#allocation2 + $0x10] sm:$0xf] %v417_v28  ;;  %420 = vst [vmem:[#allocation2 + $0x18] sm:$0xf] %v418_v29  ;;  %v424_v33 = vpop.permute.xlu1 %423  ;;  %v422_v34 = vpop.permute.xlu0 %421 }
  0xac   : > { %397 = vst [vmem:[#allocation2] sm:$0xf] %v395_v30  ;;  %398 = vst [vmem:[#allocation2 + $0x8] sm:$0xf] %v396_v31  ;;  %v426_v35 = vsel %vm425_vm2, %v422_v34, %v424_v33  ;;  %v427_v36 = vsel %vm425_vm2, %v424_v33, %v422_v34  ;;  %v564_v33 = vld [vmem:[#allocation2 + $0x40] sm:$0xff] }
  0xad   : > { %v439_v37 = vmul.f32 %v1403_v22, %v427_v36  ;;  %v440_v38 = vmul.f32 %v1406_v23, %v426_v35  ;;  %v1495_v36 = vrot.slane %v1005_v20, %v1374_v9 }
  0xaf   : > { %441 = vst [vmem:[#allocation2 + $0x20] sm:$0xf] %v439_v37  ;;  %442 = vst [vmem:[#allocation2 + $0x28] sm:$0xf] %v440_v38  ;;  %v446_v42 = vpop.permute.xlu1 %445  ;;  %v444_v43 = vpop.permute.xlu0 %443  ;;  %v1498_v37 = vrot.slane %v1005_v20, %v1376_v10 }
  0xb0   : > { %v448_v44 = vsel %vm447_vm3, %v444_v43, %v446_v42  ;;  %v449_v45 = vsel %vm447_vm3, %v446_v42, %v444_v43 }
  0xb1   : > { %v461_v46 = vmul.f32 %v1431_v39, %v449_v45  ;;  %v462_v47 = vmul.f32 %v1434_v40, %v448_v44 }
  0xb2   : > { %v559_v52 = vld [vmem:[#allocation2 + $0x18] sm:$0xff]  ;;  %v558_v57 = vld [vmem:[#allocation2 + $0x10] sm:$0xff] }
  0xb3   : > { %v557_v51 = vld [vmem:[#allocation2 + $0x8] sm:$0xff]  ;;  %v556_v53 = vld [vmem:[#allocation2] sm:$0xff]  ;;  %463 = vst [vmem:[#allocation2 + $0x30] sm:$0xf] %v461_v46  ;;  %464 = vst [vmem:[#allocation2 + $0x38] sm:$0xf] %v462_v47  ;;  %v470_v54 = vpop.permute.xlu1 %469  ;;  %v468_v55 = vpop.permute.xlu0 %467 }
  0xb4   : > { %v1015_v56 = vpack.c.bf16 %v559_v52, %v557_v51  ;;  %v472_v58 = vsel %vm471_vm4, %v468_v55, %v470_v54  ;;  %v473_v59 = vsel %vm471_vm4, %v470_v54, %v468_v55  ;;  %v1017_v60 = vpack.c.bf16 %v558_v57, %v556_v53 }
  0xb5   : > { %v485_v61 = vmul.f32 %v1447_v48, %v472_v58  ;;  %v486_v62 = vmul.f32 %v1450_v49, %v473_v59  ;;  %v555_v58 = vld [vmem:[%s1615_s2] sm:$0xff] }
  0xb6   : > { %1016 = vmatprep.subr.bf16.mxu0 %v1015_v56  ;;  %v561_v15 = vld [vmem:[#allocation2 + $0x28] sm:$0xff]  ;;  %v560_v24 = vld [vmem:[#allocation2 + $0x20] sm:$0xff] }
  0xb7   : > { %1018 = vmatpush1.bf16.msra.mxu0 %v1017_v60  ;;  %487 = vst [vmem:[#allocation2 + $0x50] sm:$0xf] %v485_v61  ;;  %488 = vst [vmem:[#allocation2 + $0x58] sm:$0xf] %v486_v62  ;;  %v492_v4 = vpop.permute.xlu1 %491  ;;  %v490_v5 = vpop.permute.xlu0 %489  ;;  %v655_v61 = vld [vmem:[#allocation3] sm:$0xff] }
  0xb8   : > { %v494_v6 = vsel %vm493_vm5, %v490_v5, %v492_v4  ;;  %v495_v7 = vsel %vm493_vm5, %v492_v4, %v490_v5  ;;  %v656_v4 = vld [vmem:[#allocation3 + $0x8] sm:$0xff]  ;;  %v659_v5 = vstv %s354_s19 }
  0xb9   : > { %v507_v11 = vmul.f32 %v1463_v63, %v494_v6  ;;  %v508_v12 = vmul.f32 %v1466_v0, %v495_v7 }
  0xba   : > { %v563_v21 = vld [vmem:[#allocation2 + $0x38] sm:$0xff]  ;;  %v562_v25 = vld [vmem:[#allocation2 + $0x30] sm:$0xff] }
  0xbb   : > { %509 = vst [vmem:[#allocation2 + $0x60] sm:$0xf] %v507_v11  ;;  %510 = vst [vmem:[#allocation2 + $0x68] sm:$0xf] %v508_v12  ;;  %v514_v26 = vpop.permute.xlu1 %513  ;;  %v512_v27 = vpop.permute.xlu0 %511  ;;  %v1019_v28 = vpack.c.bf16 %v563_v21, %v561_v15  ;;  %v1021_v29 = vpack.c.bf16 %v562_v25, %v560_v24 }
  0xbc   : > { %v516_v30 = vsel %vm515_vm6, %v512_v27, %v514_v26  ;;  %v517_v31 = vsel %vm515_vm6, %v514_v26, %v512_v27 }
  0xbd   : > { %v529_v34 = vmul.f32 %v1479_v13, %v516_v30  ;;  %v530_v35 = vmul.f32 %v1482_v14, %v517_v31  ;;  %1020 = vmatprep.subr.bf16.mxu0 %v1019_v28 }
  0xbe   : > { %1022 = vmatpush1.bf16.msra.mxu0 %v1021_v29  ;;  %v567_v38 = vld [vmem:[#allocation2 + $0x58] sm:$0xff]  ;;  %v566_v41 = vld [vmem:[#allocation2 + $0x50] sm:$0xff]  ;;  %v775_v29 = vld [vmem:[%s1618_s5] sm:$0xf] }
  0xbf   : > { %531 = vst [vmem:[#allocation2 + $0x70] sm:$0xf] %v529_v34  ;;  %532 = vst [vmem:[#allocation2 + $0x78] sm:$0xf] %v530_v35  ;;  %v536_v42 = vpop.permute.xlu1 %535  ;;  %v534_v43 = vpop.permute.xlu0 %533  ;;  %v1023_v44 = vpack.c.bf16 %v567_v38, %v565_v32  ;;  %v1025_v45 = vpack.c.bf16 %v566_v41, %v564_v33 }
  0xc0   : > { %v538_v46 = vsel %vm537_vm7, %v534_v43, %v536_v42  ;;  %v539_v47 = vsel %vm537_vm7, %v536_v42, %v534_v43 }
  0xc1   : > { %v551_v9 = vmul.f32 %v1495_v36, %v538_v46  ;;  %v552_v10 = vmul.f32 %v1498_v37, %v539_v47  ;;  %1024 = vmatprep.subr.bf16.mxu0 %v1023_v44 }
  0xc2   : > { %1026 = vmatpush1.bf16.msra.mxu0 %v1025_v45  ;;  %v569_v50 = vld [vmem:[#allocation2 + $0x68] sm:$0xff]  ;;  %v568_v52 = vld [vmem:[#allocation2 + $0x60] sm:$0xff] }
  0xc3   : > { %553 = vst [vmem:[#allocation2 + $0x80] sm:$0xf] %v551_v9  ;;  %554 = vst [vmem:[#allocation2 + $0x88] sm:$0xf] %v552_v10 }
  0xc6   : > { %v571_v51 = vld [vmem:[#allocation2 + $0x78] sm:$0xff]  ;;  %v570_v53 = vld [vmem:[#allocation2 + $0x70] sm:$0xff] }
  0xc7   : > { %v1027_v54 = vpack.c.bf16 %v571_v51, %v569_v50  ;;  %v1029_v55 = vpack.c.bf16 %v570_v53, %v568_v52 }
  0xc9   : > { %1028 = vmatprep.subr.bf16.mxu0 %v1027_v54 }
  0xca   : > { %1030 = vmatpush1.bf16.msra.mxu0 %v1029_v55  ;;  %v573_v56 = vld [vmem:[#allocation2 + $0x88] sm:$0xff]  ;;  %v572_v57 = vld [vmem:[#allocation2 + $0x80] sm:$0xff] }
  0xcb   : > { %600 = vmatprep.subr.mxu0 %v573_v56 }
  0xce   : > { %601 = vmatpush1.msra.mxu0 %v572_v57 }
  0xcf   : > { %1006 = vmatmul.mubr.msk.f32.vlgmr.msra.gmra.mrb[0].mxu0 %vm580_vm8, %v555_v58 }
  0xd0   : > { %v578_v59 = vpop.permute.xlu0 %577 }
 0x1a2   : > { %v650_v60 = vpop.f32.mrb[0].mxu0 }
 0x1a3   : > { %v651_v62 = vadd.f32 %v650_v60, %v578_v59  ;;  %v652_v2 = vpop.f32.mrb[1].mxu0 }
 0x1a4   : > { %v653_v6 = vadd.f32 %v652_v2, %v578_v59 }
 0x1a5   : > { %v657_v7 = vsub.f32 %v651_v62, %v655_v61 }
 0x1a6   : > { %v658_v11 = vsub.f32 %v653_v6, %v656_v4 }
 0x1a7   : > { %v660_v12 = vmul.f32 %v659_v5, %v657_v7 }
 0x1a8   : > { %v661_v15 = vmul.f32 %v659_v5, %v658_v11 }
 0x1a9   : > { %v1510_v20 = vadd.f32 %v660_v12, %v655_v61 }
 0x1aa   : > { %v1512_v21 = vadd.f32 %v661_v15, %v656_v4 }
 0x1ab   : > { %vm664_vm9 = vcmp.ge.f32.partialorder %v1510_v20, 1.0 }
 0x1ac   : > { %v1007_v24 = vsel %vm664_vm9, 1.0, %v1225_v3  ;;  %v670_v25 = vsel %vm664_vm9, 0.0, %v1510_v20  ;;  %vm665_vm10 = vcmp.ge.f32.partialorder %v1512_v21, 1.0  ;;  %vm1043_vm13 = vmpackc.low %vm1228_vm11, %vm664_vm9  ;;  %v756_v20 = vld [vmem:[%s1617_s4] sm:$0xf] }
 0x1ad   : > { %672 = vst [vmem:[#allocation3] sm:$0xff] %v670_v25  ;;  %v1008_v26 = vsel %vm665_vm10, 1.0, %v1225_v3  ;;  %v671_v27 = vsel %vm665_vm10, 0.0, %v1512_v21  ;;  %vm1040_vm12 = vmpackc.low %vm1228_vm11, %vm665_vm10 }
 0x1ae   : > { %673 = vst [vmem:[#allocation3 + $0x8] sm:$0xff] %v671_v27  ;;  %v1124_v28 = vpack.i.bf16 %v1008_v26, %v1007_v24 }
 0x1b0   : > { %1125 = vrot.lane.b32.xlu0 %v1124_v28, %s1219_s11  ;;  %1115 = vrot.lane.b32.xlu1 %v1124_v28, %s1218_s25  ;;  %s998_s11 = sld [smem:[#allocation6 + $0x1]] }
 0x1b4   : > { %1135 = vrot.lane.b32.xlu0 %v1124_v28, %s1221_s13  ;;  %1120 = vrot.lane.b32.xlu1 %v1124_v28, %s1217_s24 }
 0x1b8   : > { %1145 = vrot.lane.b32.xlu0 %v1124_v28, %s1223_s15  ;;  %1130 = vrot.lane.b32.xlu1 %v1124_v28, %s1220_s12 }
 0x1bc   : > { %778 = vperm.xlu0 %1113, %v775_v29   ;;  %1140 = vrot.lane.b32.xlu1 %v1124_v28, %s1222_s14 }
 0x1c0   : > { %1150 = vrot.lane.b32.xlu1 %v1124_v28, %s1224_s16 }
 0x222   : > { %v1126_v30 = vpop.permute.xlu0 %1125  ;;  %v1116_v31 = vpop.permute.xlu1 %1115 }
 0x223   : > { %v1118_v32 = vunpack.i.h.bf16 %v1116_v31  ;;  %v1117_v33 = vunpack.i.l.bf16 %v1116_v31  ;;  %v1128_v34 = vunpack.i.h.bf16 %v1126_v30  ;;  %v1127_v35 = vunpack.i.l.bf16 %v1126_v30 }
 0x225   : > { %v678_v42 = vsel %vm381_vm1, %v1117_v33, %v1118_v32  ;;  %v679_v43 = vsel %vm381_vm1, %v1118_v32, %v1117_v33  ;;  %v698_v9 = vsel %vm425_vm2, %v1127_v35, %v1128_v34  ;;  %v699_v10 = vsel %vm425_vm2, %v1128_v34, %v1127_v35 }
 0x226   : > { %v1136_v38 = vpop.permute.xlu0 %1135  ;;  %v1121_v41 = vpop.permute.xlu1 %1120  ;;  %v681_v54 = vmul.f32 %v678_v42, %v1399_v19  ;;  %v680_v56 = vmul.f32 %v679_v43, %v1396_v18  ;;  %v701_v2 = vmul.f32 %v698_v9, %v1406_v23  ;;  %v700_v4 = vmul.f32 %v699_v10, %v1403_v22 }
 0x227   : > { %v1138_v44 = vunpack.i.h.bf16 %v1136_v38  ;;  %v1137_v45 = vunpack.i.l.bf16 %v1136_v38  ;;  %v1123_v46 = vunpack.i.h.bf16 %v1121_v41  ;;  %v1122_v47 = vunpack.i.l.bf16 %v1121_v41 }
 0x229   : > { %v688_v50 = vsel %vm403_vm0, %v1122_v47, %v1123_v46  ;;  %v689_v51 = vsel %vm403_vm0, %v1123_v46, %v1122_v47  ;;  %v721_v58 = vsel %vm471_vm4, %v1138_v44, %v1137_v45 }
 0x22a   : > { %v1146_v52 = vpop.permute.xlu0 %1145  ;;  %v1131_v53 = vpop.permute.xlu1 %1130  ;;  %v691_v55 = vmul.f32 %v688_v50, %v1393_v17  ;;  %v690_v57 = vmul.f32 %v689_v51, %v1390_v16  ;;  %v720_v16 = vsel %vm471_vm4, %v1137_v45, %v1138_v44  ;;  %v723_v19 = vmul.f32 %v721_v58, %v1450_v49 }
 0x22b   : > { %v1133_v59 = vunpack.i.h.bf16 %v1131_v53  ;;  %v1132_v60 = vunpack.i.l.bf16 %v1131_v53  ;;  %v1148_v5 = vunpack.i.h.bf16 %v1146_v52  ;;  %v1147_v6 = vunpack.i.l.bf16 %v1146_v52 }
 0x22c   : > { %v1031_v61 = vpack.c.bf16 %v691_v55, %v681_v54  ;;  %v1033_v62 = vpack.c.bf16 %v690_v57, %v680_v56  ;;  %v722_v25 = vmul.f32 %v720_v16, %v1447_v48  ;;  %v861_v45 = vstv %s998_s11 }
 0x22d   : > { %v708_v17 = vsel %vm447_vm3, %v1132_v60, %v1133_v59  ;;  %v709_v18 = vsel %vm447_vm3, %v1133_v59, %v1132_v60  ;;  %v741_v26 = vsel %vm515_vm6, %v1148_v5, %v1147_v6  ;;  %v740_v48 = vsel %vm515_vm6, %v1147_v6, %v1148_v5 }
 0x22e   : > { %v1141_v7 = vpop.permute.xlu1 %1140  ;;  %1032 = vmatprep.subr.bf16.mxu1 %v1031_v61  ;;  %v711_v11 = vmul.f32 %v708_v17, %v1434_v40  ;;  %v710_v23 = vmul.f32 %v709_v18, %v1431_v39  ;;  %v1227_v40 = vmov 1.0   ;;  %v743_v32 = vmul.f32 %v741_v26, %v1482_v14 }
 0x22f   : > { %v1143_v22 = vunpack.i.h.bf16 %v1141_v7  ;;  %v1142_v12 = vunpack.i.l.bf16 %v1141_v7  ;;  %1034 = vmatpush1.bf16.msra.mxu1 %v1033_v62  ;;  %v1039_v39 = vpack.c.bf16 %v723_v19, %v1227_v40  ;;  %v1042_v33 = vpack.c.bf16 %v722_v25, %v1227_v40 }
 0x230   : > { %v1035_v15 = vpack.c.bf16 %v711_v11, %v701_v2  ;;  %v1037_v24 = vpack.c.bf16 %v710_v23, %v700_v4  ;;  %v742_v35 = vmul.f32 %v740_v48, %v1479_v13  ;;  %v855_v13 = vld [vmem:[#allocation5] sm:$0xff] }
 0x231   : > { %v731_v27 = vsel %vm493_vm5, %v1143_v22, %v1142_v12  ;;  %v730_v49 = vsel %vm493_vm5, %v1142_v12, %v1143_v22  ;;  %v857_v44 = vcombine.high %v855_v13, %v855_v13 }
 0x232   : > { %v1151_v28 = vpop.permute.xlu1 %1150  ;;  %1036 = vmatprep.subr.bf16.mxu1 %v1035_v15  ;;  %v733_v29 = vmul.f32 %v731_v27, %v1466_v0  ;;  %v732_v34 = vmul.f32 %v730_v49, %v1463_v63 }
 0x233   : > { %v1153_v30 = vunpack.i.h.bf16 %v1151_v28  ;;  %v1152_v31 = vunpack.i.l.bf16 %v1151_v28  ;;  %1038 = vmatpush1.bf16.msra.mxu1 %v1037_v24 }
 0x234   : > { %1041 = vmatprep.subr.msk.bf16.mxu1 %vm1040_vm12, %v1039_v39  ;;  %v1045_v0 = vpack.c.bf16 %v743_v32, %v733_v29  ;;  %v1047_v38 = vpack.c.bf16 %v742_v35, %v732_v34 }
 0x235   : > { %v751_v21 = vsel %vm537_vm7, %v1153_v30, %v1152_v31  ;;  %v750_v14 = vsel %vm537_vm7, %v1152_v31, %v1153_v30 }
 0x236   : > { %v753_v41 = vmul.f32 %v751_v21, %v1498_v37  ;;  %v752_v63 = vmul.f32 %v750_v14, %v1495_v36 }
 0x237   : > { %1044 = vmatpush1.bf16.msk.msra.mxu1 %vm1043_vm13, %v1042_v33 }
 0x238   : > { %1046 = vmatprep.subr.bf16.mxu1 %v1045_v0 }
 0x23b   : > { %1048 = vmatpush1.bf16.msra.mxu1 %v1047_v38  ;;  %v779_v42 = vpop.permute.xlu0 %778 }
 0x23c   : > { %800 = vmatprep.subr.mxu1 %v753_v41 }
 0x23f   : > { %801 = vmatpush1.msra.mxu1 %v752_v63 }
 0x240   : > { %1009 = vmatmul.mubr.msk.f32.vlgmr.msra.gmra.mrb[0].mxu1 %vm580_vm8, %v756_v20 }
 0x313   : > { %v850_v43 = vpop.f32.mrb[0].mxu1 }
 0x314   : > { %v851_v37 = vadd.f32 %v850_v43, %v779_v42  ;;  %v852_v8 = vpop.f32.mrb[1].mxu1 }
 0x315   : > { %v853_v46 = vadd.f32 %v852_v8, %v779_v42 }
 0x316   : > { %v859_v47 = vsub.f32 %v851_v37, %v855_v13 }
 0x317   : > { %v860_v9 = vsub.f32 %v853_v46, %v857_v44 }
 0x318   : > { %v862_v36 = vmul.f32 %v861_v45, %v859_v47 }
 0x319   : > { %v863_v10 = vmul.f32 %v861_v45, %v860_v9 }
 0x31b   : > { %v866_v50 = vcombine.low %v862_v36, %v863_v10 }
 0x31d   : > { %v868_v51 = vadd.f32 %v866_v50, %v855_v13 }
 0x31f   : > { %vm869_vm14 = vcmp.ge.f32.partialorder %v868_v51, 1.0 }
 0x320   : > { %v1010_v52 = vsel %vm869_vm14, 1.0, %v1225_v3  ;;  %v872_v53 = vsel %vm869_vm14, 0.0, %v868_v51 }
 0x321   : > { %873 = vst [vmem:[#allocation5] sm:$0xff] %v872_v53  ;;  %v874_v54 = vadd.f32 %v1010_v52, %v1338_v1 }
 0x323   : > { %875 = vst [vmem:[%s1335_s10] sm:$0xff] %v874_v54 }
 0x324 PF: > { %s18_s28 = sadd.s32 1, %s1213_s28   ;;  %s1623_s24 = smov %s1205_s26 }
 0x325   : > { %p15_p5 = scmp.ge.s32.totalorder %s18_s28, 10   ;;  %s1624_s25 = smov %s1209_s27 }
 0x326   : > { %s1625_s26 = smov %s1628_s30  ;;  %s1626_s27 = smov %s1632_s8 }
 0x327   :  { %17 = sbr.rel (!%p15_p5) target bundleno = 3 (0x3), region = 94 }
 0x32e   :  { %905 = vsyncpa [#allocation7], 1 }
 0x32f   :  { %907 = vsyncpa [#allocation7 + $0x1], 1 }

</bundles_post_ra>
